<compile_context>
chip_gen: v5e
topology: v5e:2x2
jax: 0.10.0
libtpu: 0.0.40
codegen_flags: <defaults>
</compile_context>

<pallas_src>
import jax
import jax.numpy as jnp
from jax.experimental import pallas as pl
from jax.experimental.pallas import tpu as pltpu


def attention_kernel(z_ref, w1_ref, b1_ref, w2_ref, out_ref, beta_ref):
    # z_ref   : (Bt, N, D)  block of Bt batch items
    # w1_ref  : (D, H)      first Linear weight (x @ W layout)
    # b1_ref  : (1, H)      first Linear bias
    # w2_ref  : (1, H)      second Linear weight as a row (no bias)
    # out_ref : (Bt, D)     pooled output slab
    # beta_ref: (Bt, N)     attention weights, lane-dense (wrapper restores (B,N,1))
    bt, n, d = z_ref.shape

    z = z_ref[...]                                                  # (Bt, N, D)

    # ---- Linear(D, H) + Tanh -> per-row score -----------------------------
    if n % 8 == 0:
        # (Bt, N) merge is tile-aligned (f32 sublane = 8) -> free reshape,
        # one large-M MXU matmul.
        z_flat = z.reshape(bt * n, d)                               # (Bt*N, D)
        h = jnp.tanh(
            jnp.dot(z_flat, w1_ref[...], preferred_element_type=jnp.float32)
            + b1_ref[...]
        )                                                           # (Bt*N, H)
        # Linear(H, 1, bias=False): VPU multiply + lane reduce (an Hx1 MXU
        # matmul would waste the systolic array).
        scores = jnp.sum(h * w2_ref[...], axis=-1, keepdims=True)  # (Bt*N, 1)
        s = scores.reshape(bt, n)          # single relayout -> lane-dense (Bt, N)
    else:
        # Non-tile-aligned N: keep the matmul batched so Mosaic does not
        # materialize a relayout copy of the whole z block.
        h = jnp.tanh(
            jnp.einsum("bnd,dh->bnh", z, w1_ref[...],
                       preferred_element_type=jnp.float32)
            + b1_ref[...]
        )                                                           # (Bt, N, H)
        s = jnp.sum(h * w2_ref[...], axis=-1)                       # (Bt, N)

    # ---- Softmax over the sequence axis, lane-dense ------------------------
    m = jnp.max(s, axis=-1, keepdims=True)                          # (Bt, 1)
    e = jnp.exp(s - m)                                              # (Bt, N)
    denom = jnp.sum(e, axis=-1, keepdims=True)                      # (Bt, 1)
    beta = e / denom                          # exact divide: matches f32 PyTorch

    # ---- Weighted sum over N as a batched MXU matmul -----------------------
    pooled = jnp.einsum(
        "bqn,bnd->bqd", beta.reshape(bt, 1, n), z,
        preferred_element_type=jnp.float32,
    ).reshape(bt, d)                                                # (Bt, D)

    out_ref[...] = pooled.astype(out_ref.dtype)
    beta_ref[...] = beta.astype(beta_ref.dtype)                     # lane-dense


def _round_up(x, m):
    return ((x + m - 1) // m) * m


def _tpu_generation_params():
    """Return (per-step tile budget bytes, scoped vmem_limit_bytes, force_even_multi_step)."""
    kind = ""
    try:
        kind = jax.devices()[0].device_kind.lower()
    except Exception:
        pass
    if "7" in kind:
        # v7x: 64 MiB VMEM, 2 TensorCores -> even >=2-step grid, ~48 MiB ceiling.
        return 20 * 1024 * 1024, 48 * 1024 * 1024, True
    if "v6" in kind or "6e" in kind:
        # v6e: 128 MiB VMEM, 1 TensorCore -> big tiles, no multi-step requirement.
        return 28 * 1024 * 1024, 96 * 1024 * 1024, False
    if "v5" in kind:
        # v5e: 128 MiB VMEM, 1 TensorCore.
        return 24 * 1024 * 1024, 64 * 1024 * 1024, False
    # Unknown chip: stay within the common default scoped limit.
    return 8 * 1024 * 1024, 32 * 1024 * 1024, False


def _vmem_bytes_per_step(bt, N, D, H, itemsize=4):
    """(8,128)-padding-aware estimate of per-grid-step VMEM use (f32)."""
    n8 = _round_up(N, 8)
    d_l = _round_up(D, 128)
    h_l = _round_up(H, 128)
    n_l = _round_up(N, 128)
    z_blk = bt * n8 * d_l * itemsize                         # z input tile
    act = _round_up(bt * N, 8) * h_l * itemsize              # tanh activations h
    out_blk = _round_up(bt, 8) * d_l * itemsize              # pooled output tile
    beta_blk = _round_up(bt, 8) * n_l * itemsize             # beta output tile
    w_blk = (_round_up(D, 8) * h_l + 2 * 8 * h_l) * itemsize  # W1 + b1 + w2 row
    # Inputs/outputs are double-buffered by the pipeline; activation temporaries
    # (h plus an exp/score-sized mirror) are counted once each.
    return 2 * (z_blk + out_blk + beta_blk + w_blk) + 2 * act


def _pick_block_batch(B, N, D, H, *, itemsize=4, target_z_bytes=4 * 1024 * 1024):
    """Pick batch items per grid step (byte-sized, padding-aware, chip-aware)."""
    tile_budget, vmem_limit, force_multi = _tpu_generation_params()

    z_item_bytes = _round_up(N, 8) * _round_up(D, 128) * itemsize
    want = max(1, min(B, target_z_bytes // max(z_item_bytes, 1)))
    while want > 1 and _vmem_bytes_per_step(want, N, D, H, itemsize) > tile_budget:
        want -= 1
    if force_multi and B >= 2:
        want = min(want, max(1, B // 2))          # >=2 steps so both v7x cores work

    divisors = [bt for bt in range(want, 0, -1) if B % bt == 0]
    # Prefer sublane-aligned output tiles: (bt, D)/(bt, N) want bt % 8 == 0 or bt == B.
    aligned = [bt for bt in divisors if bt == B or bt % 8 == 0]
    candidates = aligned if aligned else divisors
    if force_multi:
        even = [bt for bt in candidates if (B // bt) % 2 == 0]
        if even:
            candidates = even                      # balanced load across 2 cores
    bt = candidates[0] if candidates else 1
    return bt, vmem_limit


def attention_forward(z, w1, b1, w2, *, block_batch=None):
    """z: (B, N, D) f32. w1: (D, H), b1: (1, H), w2: (H, 1).

    Returns ((B, D) pooled, (B, N, 1) beta) — same as the PyTorch module.
    """
    B, N, D = z.shape
    H = w1.shape[1]
    w2_row = w2.reshape(1, H)                      # row layout for the VPU reduce

    if block_batch is None:
        bt, vmem_limit = _pick_block_batch(B, N, D, H)
    else:
        bt = block_batch
        _, vmem_limit, _ = _tpu_generation_params()
    assert B % bt == 0, "block batch must divide B"
    grid = (B // bt,)

    out_shape = (
        jax.ShapeDtypeStruct((B, D), z.dtype),
        jax.ShapeDtypeStruct((B, N), z.dtype),     # lane-dense beta
    )

    grid_spec = pltpu.PrefetchScalarGridSpec(
        num_scalar_prefetch=0,
        grid=grid,
        in_specs=[
            pl.BlockSpec((bt, N, D), lambda b: (b, 0, 0)),   # z block of Bt items
            pl.BlockSpec((D, H), lambda b: (0, 0)),          # W1 (constant block -> DMA once)
            pl.BlockSpec((1, H), lambda b: (0, 0)),          # b1
            pl.BlockSpec((1, H), lambda b: (0, 0)),          # W2 row
        ],
        out_specs=[
            pl.BlockSpec((bt, D), lambda b: (b, 0)),
            pl.BlockSpec((bt, N), lambda b: (b, 0)),
        ],
    )

    pooled, beta = pl.pallas_call(
        attention_kernel,
        out_shape=out_shape,
        grid_spec=grid_spec,
        compiler_params=pltpu.CompilerParams(
            dimension_semantics=("parallel",),
            vmem_limit_bytes=vmem_limit,
        ),
    )(z, w1, b1, w2_row)

    # Restore PyTorch-compatible beta shape.
    return pooled, beta.reshape(B, N, 1)


def reference_forward(z, w1, b1, w2):
    """Pure-JAX reference of the PyTorch forward."""
    w = jnp.tanh(z @ w1 + b1[None, :, :]) @ w2          # (B, N, 1)
    beta = jax.nn.softmax(w, axis=1)                    # softmax over N
    return (beta * z).sum(axis=1), beta


if __name__ == "__main__":
    # Small shapes consistent with the module: batch=16, seq=8, in_size=32, hidden=16.
    B, N, D, H = 16, 8, 32, 16

    key = jax.random.PRNGKey(0)
    kz, kw1, kb1, kw2 = jax.random.split(key, 4)

    z = jax.random.normal(kz, (B, N, D), dtype=jnp.float32)

    # Deterministic parameter init (uniform, PyTorch-Linear-style bounds).
    bound1 = 1.0 / (D ** 0.5)
    bound2 = 1.0 / (H ** 0.5)
    w1 = jax.random.uniform(kw1, (D, H), minval=-bound1, maxval=bound1, dtype=jnp.float32)
    b1 = jax.random.uniform(kb1, (1, H), minval=-bound1, maxval=bound1, dtype=jnp.float32)
    w2 = jax.random.uniform(kw2, (H, 1), minval=-bound2, maxval=bound2, dtype=jnp.float32)

    pooled, beta = attention_forward(z, w1, b1, w2)
    jax.block_until_ready((pooled, beta))

    pooled_exp, beta_exp = reference_forward(z, w1, b1, w2)
    assert pooled.shape == (B, D) and beta.shape == (B, N, 1)
    # Softmax is exact now; remaining tolerance only covers MXU vs XLA default
    # f32 matmul precision differences.
    assert jnp.allclose(pooled, pooled_exp, atol=1e-3, rtol=1e-3)
    assert jnp.allclose(beta, beta_exp, atol=1e-3, rtol=1e-3)

    print("KERNEL_OK")
</pallas_src>

<mosaic_0001>
module attributes {stable_mosaic.version = 11 : i64} {
  func.func @attention_kernel(%arg0: i32, %arg1: memref<16x8x32xf32, #tpu.memory_space<vmem>>, %arg2: memref<32x16xf32, #tpu.memory_space<vmem>>, %arg3: memref<1x16xf32, #tpu.memory_space<vmem>>, %arg4: memref<1x16xf32, #tpu.memory_space<vmem>>, %arg5: memref<16x32xf32, #tpu.memory_space<vmem>>, %arg6: memref<16x8xf32, #tpu.memory_space<vmem>>) attributes {dimension_semantics = [#tpu.dimension_semantics<parallel>], iteration_bounds = array<i64: 1>, scalar_prefetch = 0 : i64, scratch_operands = 0 : i64, tpu.core_type = #tpu.core_type<tc>, window_params = [{transform_indices = @transform_0, window_bounds = array<i64: 16, 8, 32>}, {pipeline_mode = #tpu.pipeline_mode<synchronous>, transform_indices = @transform_1, window_bounds = array<i64: 32, 16>}, {pipeline_mode = #tpu.pipeline_mode<synchronous>, transform_indices = @transform_2, window_bounds = array<i64: 1, 16>}, {pipeline_mode = #tpu.pipeline_mode<synchronous>, transform_indices = @transform_3, window_bounds = array<i64: 1, 16>}, {transform_indices = @transform_4, window_bounds = array<i64: 16, 32>}, {transform_indices = @transform_5, window_bounds = array<i64: 16, 8>}]} {
    %c0 = arith.constant 0 : index
    %c0_0 = arith.constant 0 : index
    %c0_1 = arith.constant 0 : index
    %0 = vector.load %arg1[%c0, %c0_0, %c0_1] : memref<16x8x32xf32, #tpu.memory_space<vmem>>, vector<16x8x32xf32>
    %1 = vector.shape_cast %0 : vector<16x8x32xf32> to vector<128x32xf32>
    %c0_2 = arith.constant 0 : index
    %c0_3 = arith.constant 0 : index
    %2 = vector.load %arg2[%c0_2, %c0_3] : memref<32x16xf32, #tpu.memory_space<vmem>>, vector<32x16xf32>
    %cst = arith.constant dense<0.000000e+00> : vector<128x16xf32>
    %3 = tpu.matmul %1, %2, %cst {dimension_numbers = #tpu.dot_dimension_numbers<[1], [0], [0], [1], [0, 0, 1, 1], [], []>} : vector<128x32xf32>, vector<32x16xf32>, vector<128x16xf32> -> vector<128x16xf32>
    %c0_4 = arith.constant 0 : index
    %c0_5 = arith.constant 0 : index
    %4 = vector.load %arg3[%c0_4, %c0_5] : memref<1x16xf32, #tpu.memory_space<vmem>>, vector<1x16xf32>
    %5 = vector.broadcast %4 : vector<1x16xf32> to vector<128x16xf32>
    %6 = arith.addf %3, %5 : vector<128x16xf32>
    %7 = math.tanh %6 : vector<128x16xf32>
    %c0_6 = arith.constant 0 : index
    %c0_7 = arith.constant 0 : index
    %8 = vector.load %arg4[%c0_6, %c0_7] : memref<1x16xf32, #tpu.memory_space<vmem>>, vector<1x16xf32>
    %9 = vector.broadcast %8 : vector<1x16xf32> to vector<128x16xf32>
    %10 = arith.mulf %7, %9 : vector<128x16xf32>
    %cst_8 = arith.constant dense<0.000000e+00> : vector<128xf32>
    %11 = vector.multi_reduction <add>, %10, %cst_8 [1] : vector<128x16xf32> to vector<128xf32>
    %12 = vector.shape_cast %11 : vector<128xf32> to vector<128x1xf32>
    %13 = vector.shape_cast %12 : vector<128x1xf32> to vector<16x8xf32>
    %cst_9 = arith.constant dense<0xFF800000> : vector<16xf32>
    %14 = vector.multi_reduction <maximumf>, %13, %cst_9 [1] : vector<16x8xf32> to vector<16xf32>
    %15 = vector.shape_cast %14 : vector<16xf32> to vector<16x1xf32>
    %16 = vector.broadcast %15 : vector<16x1xf32> to vector<16x8xf32>
    %17 = arith.subf %13, %16 : vector<16x8xf32>
    %18 = math.exp %17 : vector<16x8xf32>
    %cst_10 = arith.constant dense<0.000000e+00> : vector<16xf32>
    %19 = vector.multi_reduction <add>, %18, %cst_10 [1] : vector<16x8xf32> to vector<16xf32>
    %20 = vector.shape_cast %19 : vector<16xf32> to vector<16x1xf32>
    %21 = vector.broadcast %20 : vector<16x1xf32> to vector<16x8xf32>
    %22 = arith.divf %18, %21 : vector<16x8xf32>
    %23 = vector.shape_cast %22 : vector<16x8xf32> to vector<16x1x8xf32>
    "tpu.trace_start"() <{level = 10 : i32, message = "bqn,bnd->bqd"}> : () -> ()
    %cst_11 = arith.constant dense<0.000000e+00> : vector<16x1x32xf32>
    %24 = tpu.matmul %23, %0, %cst_11 {dimension_numbers = #tpu.dot_dimension_numbers<[2], [1], [1], [2], [0, 0, 0, 1, 1, 2], [0], [0]>} : vector<16x1x8xf32>, vector<16x8x32xf32>, vector<16x1x32xf32> -> vector<16x1x32xf32>
    "tpu.trace_stop"() : () -> ()
    %25 = vector.shape_cast %24 : vector<16x1x32xf32> to vector<16x32xf32>
    %c0_12 = arith.constant 0 : index
    %c0_13 = arith.constant 0 : index
    %26 = vector.load %arg5[%c0_12, %c0_13] : memref<16x32xf32, #tpu.memory_space<vmem>>, vector<16x32xf32>
    tpu.vector_store %arg5[%c0_12, %c0_13], %25 {strides = array<i32>} : memref<16x32xf32, #tpu.memory_space<vmem>>, vector<16x32xf32>,
    %c0_14 = arith.constant 0 : index
    %c0_15 = arith.constant 0 : index
    %27 = vector.load %arg6[%c0_14, %c0_15] : memref<16x8xf32, #tpu.memory_space<vmem>>, vector<16x8xf32>
    tpu.vector_store %arg6[%c0_14, %c0_15], %22 {strides = array<i32>} : memref<16x8xf32, #tpu.memory_space<vmem>>, vector<16x8xf32>,
    return
  }
  func.func @transform_0(%arg0: i32) -> (i32, i32, i32) {
    %c0_i32 = arith.constant 0 : i32
    %c0_i32_0 = arith.constant 0 : i32
    %c0_i32_1 = arith.constant 0 : i32
    return %arg0, %c0_i32, %c0_i32_0 : i32, i32, i32
  }
  func.func @transform_1(%arg0: i32) -> (i32, i32) {
    %c0_i32 = arith.constant 0 : i32
    %c0_i32_0 = arith.constant 0 : i32
    %c0_i32_1 = arith.constant 0 : i32
    return %c0_i32, %c0_i32_0 : i32, i32
  }
  func.func @transform_2(%arg0: i32) -> (i32, i32) {
    %c0_i32 = arith.constant 0 : i32
    %c0_i32_0 = arith.constant 0 : i32
    %c0_i32_1 = arith.constant 0 : i32
    return %c0_i32, %c0_i32_0 : i32, i32
  }
  func.func @transform_3(%arg0: i32) -> (i32, i32) {
    %c0_i32 = arith.constant 0 : i32
    %c0_i32_0 = arith.constant 0 : i32
    %c0_i32_1 = arith.constant 0 : i32
    return %c0_i32, %c0_i32_0 : i32, i32
  }
  func.func @transform_4(%arg0: i32) -> (i32, i32) {
    %c0_i32 = arith.constant 0 : i32
    %c0_i32_0 = arith.constant 0 : i32
    return %arg0, %c0_i32 : i32, i32
  }
  func.func @transform_5(%arg0: i32) -> (i32, i32) {
    %c0_i32 = arith.constant 0 : i32
    %c0_i32_0 = arith.constant 0 : i32
    return %arg0, %c0_i32 : i32, i32
  }
}

</mosaic_0001>

<bundles_post_ra>
// kernel: tpu_custom_call.1
= control target key start
LH: loop header
LB: loop body
LE: loop exit
PB: predicated region body
PF: predicated region fallthrough
CT: control target
= control target key end

     0   :  { %11 = vsyncpa [#allocation3], 0  ;;  %s2177_s0 = inlined_call_operand.hbm [shape: f32[16,8,32], index: 0, kind: input, shape index: {}]   ;;  %s2178_s1 = inlined_call_operand.vmem [shape: f32[32,16], index: 1, kind: input, shape index: {}]   ;;  %s2179_s2 = inlined_call_operand.vmem [shape: f32[1,16], index: 2, kind: input, shape index: {}]   ;;  %s2180_s3 = inlined_call_operand.vmem [shape: f32[1,16], index: 3, kind: input, shape index: {}]   ;;  %s2181_s4 = inlined_call_operand.hbm [shape: f32[16,32], index: 4, kind: output, shape index: {0}]   ;;  %s2182_s5 = inlined_call_operand.vmem [shape: f32[16,8], index: 5, kind: output, shape index: {1}]  }
   0x1   :  { %12 = vsyncpa [#allocation4], 0  ;;  %s17_s20 = sshll.u32 %s2177_s0, 4  ;;  %s1514_s21 = smov [#allocation2]   ;;  %s18_s20 = int_to_ptr.hbm [resolvable:$true] %s17_s20 }
   0x2   :  { %s19_s22 = sshll.u32 %s1514_s21, 4  ;;  %s1515_s23 = smov 128   ;;  %s20_s22 = int_to_ptr.vmem [resolvable:$true] %s19_s22 }
   0x3   :  { %s1516_s24 = smov 8  }
   0x4   :  { %25 = dma.hbm_to_vmem [thread:$0]  %s18_s20, 2048, %s20_s22, [#allocation3], %s1515_s23, %s1515_s23, %s1516_s24  }
   0x5   :  { %1510 = dma.done.wait [#allocation3], 2048  }
   0x6   :  { %1511 = vsyncadd [#allocation3], 4294965248  ;;  %v55_v0 = vld [vmem:[%s2178_s1 + $0x18] sm:$0xff]  ;;  %v54_v1 = vld [vmem:[%s2178_s1 + $0x10] sm:$0xff]  ;;  %vm2183_vm0 = vcmask 261120   ;;  %vm210_vm1 = vcmask 130048  }
   0x7   :  { %121 = vmatpush.msra.mxu0 %v55_v0  ;;  %1335 = vmatpush.msra.mxu2 %v55_v0  ;;  %v53_v2 = vld [vmem:[%s2178_s1 + $0x8] sm:$0xff]  ;;  %v52_v3 = vld [vmem:[%s2178_s1] sm:$0xff]  ;;  %v38_v6 = vld [vmem:[#allocation2 + $0x10] sm:$0xff]  ;;  %vm293_vm2 = vcmask 1041409   ;;  %vm295_vm3 = vcmask 1042434   ;;  %vm297_vm4 = vcmask 1043459  }
   0x8   :  { %1334 = vmatpush.msra.mxu1 %v55_v0  ;;  %1336 = vmatpush.msra.mxu3 %v55_v0  ;;  %v36_v4 = vld [vmem:[#allocation2] sm:$0xff]  ;;  %v37_v5 = vld [vmem:[#allocation2 + $0x8] sm:$0xff]  ;;  %v46_v7 = vld [vmem:[#allocation2 + $0x50] sm:$0xff]  ;;  %vm2187_vm5 = vcmask 1044484   ;;  %vm2186_vm6 = vcmask 1045509   ;;  %vm2185_vm7 = vcmask 1046534  }
   0x9   :  { %122 = vmatpush.msra.mxu0 %v54_v1  ;;  %1338 = vmatpush.msra.mxu2 %v54_v1  ;;  %v40_v8 = vld [vmem:[#allocation2 + $0x20] sm:$0xff]  ;;  %v47_v10 = vld [vmem:[#allocation2 + $0x58] sm:$0xff]  ;;  %v49_v11 = vld [vmem:[#allocation2 + $0x68] sm:$0xff]  ;;  %vm2184_vm8 = vcmask 1047559   ;;  %vm316_vm9 = vcmask 64512   ;;  %s1285_s15 = sshll.u32 %s2181_s4, 4  ;;  %s1286_s15 = int_to_ptr.hbm [resolvable:$true] %s1285_s15 }
   0xa   :  { %1337 = vmatpush.msra.mxu1 %v54_v1  ;;  %1339 = vmatpush.msra.mxu3 %v54_v1  ;;  %v44_v9 = vld [vmem:[#allocation2 + $0x40] sm:$0xff]  ;;  %v39_v12 = vld [vmem:[#allocation2 + $0x18] sm:$0xff]  ;;  %v41_v13 = vld [vmem:[#allocation2 + $0x28] sm:$0xff] }
   0xb   :  { %123 = vmatpush.msra.mxu0 %v53_v2  ;;  %1341 = vmatpush.msra.mxu2 %v53_v2  ;;  %v45_v14 = vld [vmem:[#allocation2 + $0x48] sm:$0xff]  ;;  %v48_v15 = vld [vmem:[#allocation2 + $0x60] sm:$0xff]  ;;  %v50_v16 = vld [vmem:[#allocation2 + $0x70] sm:$0xff] }
   0xc   :  { %1340 = vmatpush.msra.mxu1 %v53_v2  ;;  %1342 = vmatpush.msra.mxu3 %v53_v2  ;;  %v51_v17 = vld [vmem:[#allocation2 + $0x78] sm:$0xff]  ;;  %v42_v18 = vld [vmem:[#allocation2 + $0x30] sm:$0xff]  ;;  %v1586_v20 = vld [vmem:[%s2179_s2] ss:$0 sm:$0xff] }
   0xd   :  { %124 = vmatpush.msra.mxu0 %v52_v3  ;;  %1344 = vmatpush.msra.mxu2 %v52_v3  ;;  %v43_v19 = vld [vmem:[#allocation2 + $0x38] sm:$0xff]  ;;  %v1592_v23 = vld [vmem:[%s2180_s3] ss:$0 sm:$0xff] }
   0xe   :  { %1302 = vmatmul.msk.f32.vlgmr.msra.gmra.mxu0 %vm2183_vm0, %v36_v4  ;;  %1343 = vmatpush.msra.mxu1 %v52_v3 }
   0xf   :  { %1345 = vmatpush.msra.mxu3 %v52_v3  ;;  %830 = vmatpush.msrb.mxu2 %v37_v5 }
  0x10   :  { %803 = vmatpush.msrb.mxu1 %v36_v4  ;;  %1312 = vmatmul.msk.f32.vlgmr.msra.gmra.mxu2 %vm2183_vm0, %v46_v7 }
  0x11   :  { %857 = vmatpush.msrb.mxu3 %v38_v6  ;;  %911 = vmatpush.msra.mxu2 %v40_v8 }
  0x12   :  { %1310 = vmatmul.msk.f32.vlgmr.msra.gmra.mxu1 %vm2183_vm0, %v44_v9  ;;  %1315 = vmatmul.msk.f32.vlgmr.msra.gmra.mxu3 %vm2183_vm0, %v49_v11 }
  0x13   :  { %884 = vmatpush.msra.mxu1 %v39_v12  ;;  %938 = vmatpush.msra.mxu3 %v41_v13 }
  0x16   :  { %1303 = vmatmul.msk.f32.gmra.mxu0 %vm2183_vm0, %v37_v5 }
  0x18   :  { %1313 = vmatmul.msk.f32.gmra.mxu2 %vm2183_vm0, %v47_v10 }
  0x1a   :  { %1311 = vmatmul.msk.f32.gmra.mxu1 %vm2183_vm0, %v45_v14  ;;  %1316 = vmatmul.msk.f32.gmra.mxu3 %vm2183_vm0, %v50_v16 }
  0x1e   :  { %1304 = vmatmul.msk.f32.gmra.mxu0 %vm2183_vm0, %v38_v6 }
  0x20   :  { %1314 = vmatmul.msk.f32.gmra.mxu2 %vm2183_vm0, %v48_v15 }
  0x22   :  { %1317 = vmatmul.msk.f32.gmra.mxu3 %vm2183_vm0, %v51_v17 }
  0x26   :  { %1305 = vmatmul.msk.f32.gmra.mxu0 %vm2183_vm0, %v39_v12 }
  0x2e   :  { %1306 = vmatmul.msk.f32.gmra.mxu0 %vm2183_vm0, %v40_v8 }
  0x36   :  { %1307 = vmatmul.msk.f32.gmra.mxu0 %vm2183_vm0, %v41_v13 }
  0x3e   :  { %1308 = vmatmul.msk.f32.gmra.mxu0 %vm2183_vm0, %v42_v18 }
  0x46   :  { %1309 = vmatmul.msk.f32.gmra.mxu0 %vm2183_vm0, %v43_v19 }
  0x8b   :  { %v126_v21 = vpop.f32.mrf.mxu0 }
  0x8c   :  { %v127_v22 = vadd.f32 %v1586_v20, %v126_v21 }
  0x8e   :  { %1356 = vtanh.f32 %v127_v22 }
  0x8f   :  { %v150_v53 = vpop.f32.mrf.mxu1 }
  0x90   :  { %v151_v60 = vadd.f32 %v1586_v20, %v150_v53 }
  0x93   :  { %v129_v24 = vpop.f32.mrf.mxu0  ;;  %v156_v33 = vpop.f32.mrf.mxu2 }
  0x94   :  { %v1357_v25 = vpop.eup %1356  ;;  %v130_v26 = vadd.f32 %v1586_v20, %v129_v24  ;;  %v157_v36 = vadd.f32 %v1586_v20, %v156_v33 }
  0x95   :  { %v194_v27 = vmul.f32 %v1357_v25, %v1592_v23  ;;  %v165_v41 = vpop.f32.mrf.mxu3 }
  0x96   :  { %1358 = vtanh.f32 %v130_v26  ;;  %v166_v44 = vadd.f32 %v1586_v20, %v165_v41 }
  0x97   :  { %v211_v28 = vsel %vm210_vm1, %v194_v27, 0.0  ;;  %v153_v5 = vpop.f32.mrf.mxu1 }
  0x98   :  { %212 = vadd.xlane.f32.xlu0 %v211_v28  ;;  %v154_v12 = vadd.f32 %v1586_v20, %v153_v5 }
  0x9b   :  { %v132_v29 = vpop.f32.mrf.mxu0  ;;  %v159_v40 = vpop.f32.mrf.mxu2 }
  0x9c   :  { %v1359_v30 = vpop.eup %1358  ;;  %v133_v31 = vadd.f32 %v1586_v20, %v132_v29  ;;  %v160_v14 = vadd.f32 %v1586_v20, %v159_v40 }
  0x9d   :  { %v195_v32 = vmul.f32 %v1359_v30, %v1592_v23  ;;  %v168_v51 = vpop.f32.mrf.mxu3 }
  0x9e   :  { %1360 = vtanh.f32 %v133_v31  ;;  %v169_v55 = vadd.f32 %v1586_v20, %v168_v51 }
  0x9f   :  { %v214_v34 = vsel %vm210_vm1, %v195_v32, 0.0 }
  0xa0   :  { %215 = vadd.xlane.f32.xlu0 %v214_v34 }
  0xa3   :  { %v135_v35 = vpop.f32.mrf.mxu0  ;;  %v162_v49 = vpop.f32.mrf.mxu2 }
  0xa4   :  { %v1361_v37 = vpop.eup %1360  ;;  %v136_v38 = vadd.f32 %v1586_v20, %v135_v35  ;;  %v163_v50 = vadd.f32 %v1586_v20, %v162_v49 }
  0xa5   :  { %v196_v39 = vmul.f32 %v1361_v37, %v1592_v23  ;;  %v171_v0 = vpop.f32.mrf.mxu3 }
  0xa6   :  { %1362 = vtanh.f32 %v136_v38  ;;  %v172_v2 = vadd.f32 %v1586_v20, %v171_v0 }
  0xa7   :  { %v217_v42 = vsel %vm210_vm1, %v196_v39, 0.0  ;;  %1364 = vtanh.f32 %v157_v36 }
  0xa8   :  { %218 = vadd.xlane.f32.xlu1 %v217_v42 }
  0xab   :  { %v138_v43 = vpop.f32.mrf.mxu0 }
  0xac   :  { %v1363_v45 = vpop.eup %1362  ;;  %v139_v46 = vadd.f32 %v1586_v20, %v138_v43  ;;  %v275_v43 = vlaneseq }
  0xad   :  { %v1365_v47 = vpop.eup %1364  ;;  %v197_v48 = vmul.f32 %v1363_v45, %v1592_v23 }
  0xae   :  { %1366 = vtanh.f32 %v139_v46  ;;  %v204_v54 = vmul.f32 %v1365_v47, %v1592_v23 }
  0xaf   :  { %v220_v52 = vsel %vm210_vm1, %v197_v48, 0.0  ;;  %1368 = vtanh.f32 %v166_v44  ;;  %v1651_v44 = vand.u32 127, %v275_v43 }
  0xb0   :  { %221 = vadd.xlane.f32.xlu1 %v220_v52  ;;  %1370 = vtanh.f32 %v163_v50  ;;  %v241_v56 = vsel %vm210_vm1, %v204_v54, 0.0 }
  0xb1   :  { %1372 = vtanh.f32 %v169_v55 }
  0xb3   :  { %v141_v57 = vpop.f32.mrf.mxu0 }
  0xb4   :  { %v1367_v58 = vpop.eup %1366  ;;  %v142_v59 = vadd.f32 %v1586_v20, %v141_v57 }
  0xb5   :  { %v1369_v61 = vpop.eup %1368  ;;  %v198_v62 = vmul.f32 %v1367_v58, %v1592_v23 }
  0xb6   :  { %v1371_v63 = vpop.eup %1370  ;;  %1374 = vtanh.f32 %v142_v59  ;;  %v207_v4 = vmul.f32 %v1369_v61, %v1592_v23 }
  0xb7   :  { %v223_v1 = vsel %vm210_vm1, %v198_v62, 0.0  ;;  %v206_v3 = vmul.f32 %v1371_v63, %v1592_v23  ;;  %1376 = vtanh.f32 %v151_v60  ;;  %v1373_v8 = vpop.eup %1372 }
  0xb8   :  { %224 = vadd.xlane.f32.xlu2 %v223_v1  ;;  %1378 = vtanh.f32 %v172_v2  ;;  %v250_v7 = vsel %vm210_vm1, %v207_v4, 0.0  ;;  %v208_v16 = vmul.f32 %v1373_v8, %v1592_v23 }
  0xb9   :  { %v247_v6 = vsel %vm210_vm1, %v206_v3, 0.0 }
  0xba   :  { %v253_v19 = vsel %vm210_vm1, %v208_v16, 0.0 }
  0xbb   :  { %v144_v9 = vpop.f32.mrf.mxu0 }
  0xbc   :  { %v1375_v10 = vpop.eup %1374  ;;  %v145_v11 = vadd.f32 %v1586_v20, %v144_v9 }
  0xbd   :  { %v199_v13 = vmul.f32 %v1375_v10, %v1592_v23  ;;  %v1377_v15 = vpop.eup %1376 }
  0xbe   :  { %1380 = vtanh.f32 %v145_v11  ;;  %v1379_v17 = vpop.eup %1378  ;;  %v202_v22 = vmul.f32 %v1377_v15, %v1592_v23 }
  0xbf   :  { %v226_v18 = vsel %vm210_vm1, %v199_v13, 0.0  ;;  %1382 = vtanh.f32 %v154_v12  ;;  %v209_v21 = vmul.f32 %v1379_v17, %v1592_v23 }
  0xc0   :  { %227 = vadd.xlane.f32.xlu2 %v226_v18  ;;  %1384 = vtanh.f32 %v160_v14  ;;  %v235_v29 = vsel %vm210_vm1, %v202_v22, 0.0 }
  0xc1   :  { %v256_v24 = vsel %vm210_vm1, %v209_v21, 0.0 }
  0xc3   :  { %v147_v25 = vpop.f32.mrf.mxu0 }
  0xc4   :  { %v1381_v26 = vpop.eup %1380  ;;  %v148_v27 = vadd.f32 %v1586_v20, %v147_v25 }
  0xc5   :  { %v200_v28 = vmul.f32 %v1381_v26, %v1592_v23  ;;  %v1383_v30 = vpop.eup %1382  ;;  %v1517_v26 = vmov 0  }
  0xc6   :  { %1386 = vtanh.f32 %v148_v27  ;;  %v1385_v31 = vpop.eup %1384  ;;  %v203_v33 = vmul.f32 %v1383_v30, %v1592_v23  ;;  %1353 = vset.pattern.permute.xlu2 %v1517_v26  ;;  %1352 = vset.pattern.permute.xlu1 %v1517_v26 }
  0xc7   :  { %v229_v32 = vsel %vm210_vm1, %v200_v28, 0.0  ;;  %v205_v34 = vmul.f32 %v1385_v31, %v1592_v23  ;;  %1351 = vset.pattern.permute.xlu0 %v1517_v26 }
  0xc8   :  { %230 = vadd.xlane.f32.xlu0 %v229_v32  ;;  %236 = vadd.xlane.f32.xlu2 %v235_v29  ;;  %v238_v20 = vsel %vm210_vm1, %v203_v33, 0.0 }
  0xc9   :  { %v244_v37 = vsel %vm210_vm1, %v205_v34, 0.0 }
  0xcc   :  { %v1387_v35 = vpop.eup %1386 }
  0xcd   :  { %v201_v36 = vmul.f32 %v1387_v35, %v1592_v23 }
  0xcf   :  { %v232_v38 = vsel %vm210_vm1, %v201_v36, 0.0 }
  0xd0   :  { %233 = vadd.xlane.f32.xlu1 %v232_v38  ;;  %239 = vadd.xlane.f32.xlu0 %v238_v20 }
  0xd1   :  { %245 = vadd.xlane.f32.xlu2 %v244_v37 }
  0xd8   :  { %242 = vadd.xlane.f32.xlu1 %v241_v56  ;;  %248 = vadd.xlane.f32.xlu0 %v247_v6 }
  0xd9   :  { %254 = vadd.xlane.f32.xlu2 %v253_v19 }
  0xe0   :  { %251 = vadd.xlane.f32.xlu1 %v250_v7  ;;  %257 = vadd.xlane.f32.xlu0 %v256_v24 }
 0x10b   :  { %v1641_v39 = vpop.xlane.xlu0 %212 }
 0x10c   :  { %v277_v50 = vperm.slane %v1641_v39, %v1651_v44 }
 0x113   :  { %v1647_v23 = vpop.xlane.xlu0 %215 }
 0x114   :  { %v278_v47 = vperm.slane %v1647_v23, %v1651_v44 }
 0x116   :  { %v294_v53 = vsel %vm293_vm2, %v278_v47, %v277_v50 }
 0x11b   :  { %v1645_v41 = vpop.xlane.xlu1 %218 }
 0x11c   :  { %v279_v49 = vperm.slane %v1645_v41, %v1651_v44 }
 0x11e   :  { %v296_v55 = vsel %vm295_vm3, %v279_v49, %v294_v53 }
 0x123   :  { %v1653_v45 = vpop.xlane.xlu1 %221 }
 0x124   :  { %v280_v51 = vperm.slane %v1653_v45, %v1651_v44 }
 0x126   :  { %v298_v57 = vsel %vm297_vm4, %v280_v51, %v296_v55 }
 0x12b   :  { %v1643_v40 = vpop.xlane.xlu2 %224 }
 0x12c   :  { %v281_v52 = vperm.slane %v1643_v40, %v1651_v44 }
 0x12e   :  { %v300_v58 = vsel %vm2187_vm5, %v281_v52, %v298_v57 }
 0x133   :  { %v1649_v42 = vpop.xlane.xlu2 %227 }
 0x134   :  { %v282_v54 = vperm.slane %v1649_v42, %v1651_v44 }
 0x136   :  { %v302_v62 = vsel %vm2186_vm6, %v282_v54, %v300_v58 }
 0x13b   :  { %v1655_v46 = vpop.xlane.xlu0 %230  ;;  %v1659_v48 = vpop.xlane.xlu2 %236 }
 0x13c   :  { %v283_v56 = vperm.slane %v1655_v46, %v1651_v44  ;;  %v285_v2 = vperm.slane %v1659_v48, %v1651_v44 }
 0x13e   :  { %v304_v63 = vsel %vm2185_vm7, %v283_v56, %v302_v62 }
 0x143   :  { %v234_v59 = vpop.xlane.xlu1 %233  ;;  %v1677_v60 = vpop.xlane.xlu0 %239 }
 0x144   :  { %v284_v61 = vperm.slane %v234_v59, %v1651_v44  ;;  %v1683_v1 = vpop.xlane.xlu2 %245  ;;  %v286_v3 = vperm.slane %v1677_v60, %v1651_v44 }
 0x145   :  { %v288_v9 = vperm.slane %v1683_v1, %v1651_v44 }
 0x146   :  { %v306_v0 = vsel %vm2184_vm8, %v284_v61, %v304_v63  ;;  %v307_v5 = vsel %vm293_vm2, %v286_v3, %v285_v2 }
 0x147   :  { %v317_v4 = vsel %vm316_vm9, %v306_v0, -inf }
 0x148   :  { %318 = vmax.xlane.f32.xlu1 %v317_v4 }
 0x14b   :  { %v1691_v6 = vpop.xlane.xlu1 %242  ;;  %v1693_v7 = vpop.xlane.xlu0 %248 }
 0x14c   :  { %v287_v8 = vperm.slane %v1691_v6, %v1651_v44  ;;  %v289_v11 = vperm.slane %v1693_v7, %v1651_v44  ;;  %v1703_v13 = vpop.xlane.xlu2 %254 }
 0x14d   :  { %v291_v16 = vperm.slane %v1703_v13, %v1651_v44 }
 0x14e   :  { %v308_v10 = vsel %vm295_vm3, %v287_v8, %v307_v5 }
 0x14f   :  { %v309_v12 = vsel %vm297_vm4, %v288_v9, %v308_v10 }
 0x150   :  { %v310_v14 = vsel %vm2187_vm5, %v289_v11, %v309_v12 }
 0x153   :  { %v1706_v15 = vpop.xlane.xlu1 %251  ;;  %v1710_v17 = vpop.xlane.xlu0 %257 }
 0x154   :  { %v290_v18 = vperm.slane %v1706_v15, %v1651_v44  ;;  %v292_v19 = vperm.slane %v1710_v17, %v1651_v44 }
 0x156   :  { %v311_v21 = vsel %vm2186_vm6, %v290_v18, %v310_v14 }
 0x157   :  { %v312_v22 = vsel %vm2185_vm7, %v291_v16, %v311_v21 }
 0x158   :  { %v313_v24 = vsel %vm2184_vm8, %v292_v19, %v312_v22 }
 0x159   :  { %v320_v25 = vsel %vm316_vm9, %v313_v24, -inf }
 0x15a   :  { %321 = vmax.xlane.f32.xlu2 %v320_v25 }
 0x1bb   :  { %v319_v27 = vpop.xlane.xlu1 %318 }
 0x1bc   :  { %v326_v28 = vperm.slane %v319_v27, 1  ;;  %v325_v29 = vperm.slane %v319_v27, 0  ;;  %v327_v30 = vperm.slane %v319_v27, 2  ;;  %v329_v34 = vperm.slane %v319_v27, 4 }
 0x1bd   :  { %v332_v35 = vperm.slane %v319_v27, 7  ;;  %v328_v36 = vperm.slane %v319_v27, 3 }
 0x1be   :  { %v358_v31 = vsub.f32 %v1647_v23, %v326_v28  ;;  %v357_v32 = vsub.f32 %v1641_v39, %v325_v29  ;;  %v359_v33 = vsub.f32 %v1645_v41, %v327_v30  ;;  %v361_v43 = vsub.f32 %v1643_v40, %v329_v34 }
 0x1bf   :  { %v364_v47 = vsub.f32 %v234_v59, %v332_v35  ;;  %v360_v49 = vsub.f32 %v1653_v45, %v328_v36  ;;  %v331_v23 = vperm.slane %v319_v27, 6  ;;  %v330_v39 = vperm.slane %v319_v27, 5 }
 0x1c0   :  { %v375_v20 = vmul.f32 1.442695, %v358_v31  ;;  %v373_v37 = vmul.f32 1.442695, %v357_v32  ;;  %v377_v38 = vmul.f32 1.442695, %v359_v33 }
 0x1c1   :  { %v381_v50 = vmul.f32 1.442695, %v361_v43  ;;  %v387_v51 = vmul.f32 1.442695, %v364_v47  ;;  %v379_v41 = vmul.f32 1.442695, %v360_v49  ;;  %v363_v40 = vsub.f32 %v1655_v46, %v331_v23 }
 0x1c2   :  { %1388 = vpow2.f32 %v375_v20  ;;  %v362_v45 = vsub.f32 %v1649_v42, %v330_v39 }
 0x1c3   :  { %1390 = vpow2.f32 %v373_v37  ;;  %v385_v56 = vmul.f32 1.442695, %v363_v40 }
 0x1c4   :  { %1392 = vpow2.f32 %v377_v38  ;;  %v383_v59 = vmul.f32 1.442695, %v362_v45 }
 0x1c5   :  { %1394 = vpow2.f32 %v381_v50 }
 0x1c6   :  { %1396 = vpow2.f32 %v387_v51 }
 0x1c7   :  { %1398 = vpow2.f32 %v379_v41 }
 0x1c8   :  { %v1725_v52 = vpop.eup %1388  ;;  %1400 = vpow2.f32 %v385_v56 }
 0x1c9   :  { %v1727_v53 = vpop.eup %1390  ;;  %425 = vperm.xlu1 %1352, %v1725_v52   ;;  %1402 = vpow2.f32 %v383_v59 }
 0x1ca   :  { %v1730_v54 = vpop.eup %1392  ;;  %422 = vperm.xlu0 %1351, %v1727_v53  }
 0x1cb   :  { %428 = vperm.xlu2 %1353, %v1730_v54   ;;  %v1736_v62 = vpop.eup %1394 }
 0x1cc   :  { %v1739_v2 = vpop.eup %1396 }
 0x1cd   :  { %v322_v55 = vpop.xlane.xlu2 %321  ;;  %v1742_v46 = vpop.eup %1398 }
 0x1ce   :  { %v335_v57 = vperm.slane %v322_v55, 2  ;;  %v334_v58 = vperm.slane %v322_v55, 1  ;;  %v333_v61 = vperm.slane %v322_v55, 0  ;;  %v338_v0 = vperm.slane %v322_v55, 5  ;;  %v1749_v10 = vpop.eup %1400 }
 0x1cf   :  { %v337_v8 = vperm.slane %v322_v55, 4  ;;  %v336_v12 = vperm.slane %v322_v55, 3  ;;  %v1751_v14 = vpop.eup %1402  ;;  %v340_v18 = vperm.slane %v322_v55, 7  ;;  %v339_v22 = vperm.slane %v322_v55, 6 }
 0x1d0   :  { %v367_v63 = vsub.f32 %v1691_v6, %v335_v57  ;;  %v366_v3 = vsub.f32 %v1677_v60, %v334_v58  ;;  %v365_v4 = vsub.f32 %v1659_v48, %v333_v61  ;;  %v370_v5 = vsub.f32 %v1706_v15, %v338_v0 }
 0x1d1   :  { %434 = vperm.xlu1 %1352, %v1736_v62   ;;  %v369_v16 = vsub.f32 %v1693_v7, %v337_v8  ;;  %v368_v48 = vsub.f32 %v1683_v1, %v336_v12  ;;  %v372_v7 = vsub.f32 %v1710_v17, %v340_v18  ;;  %v371_v1 = vsub.f32 %v1703_v13, %v339_v22 }
 0x1d2   :  { %443 = vperm.xlu0 %1351, %v1739_v2   ;;  %v393_v42 = vmul.f32 1.442695, %v367_v63  ;;  %v391_v6 = vmul.f32 1.442695, %v366_v3  ;;  %v389_v9 = vmul.f32 1.442695, %v365_v4 }
 0x1d3   :  { %431 = vperm.xlu2 %1353, %v1742_v46   ;;  %v399_v11 = vmul.f32 1.442695, %v370_v5  ;;  %v397_v15 = vmul.f32 1.442695, %v369_v16  ;;  %v395_v21 = vmul.f32 1.442695, %v368_v48 }
 0x1d4   :  { %1404 = vpow2.f32 %v393_v42  ;;  %v403_v26 = vmul.f32 1.442695, %v372_v7  ;;  %v401_v28 = vmul.f32 1.442695, %v371_v1 }
 0x1d5   :  { %1406 = vpow2.f32 %v391_v6 }
 0x1d6   :  { %1408 = vpow2.f32 %v389_v9 }
 0x1d7   :  { %1410 = vpow2.f32 %v399_v11 }
 0x1d8   :  { %1412 = vpow2.f32 %v397_v15 }
 0x1d9   :  { %440 = vperm.xlu1 %1352, %v1749_v10   ;;  %1414 = vpow2.f32 %v395_v21 }
 0x1da   :  { %v1754_v60 = vpop.eup %1404  ;;  %1416 = vpow2.f32 %v403_v26 }
 0x1db   :  { %437 = vperm.xlu2 %1353, %v1751_v14   ;;  %452 = vperm.xlu0 %1351, %v1754_v60   ;;  %v1760_v19 = vpop.eup %1406  ;;  %1418 = vpow2.f32 %v401_v28 }
 0x1dc   :  { %v1762_v24 = vpop.eup %1408 }
 0x1dd   :  { %v1765_v25 = vpop.eup %1410 }
 0x1de   :  { %v1771_v27 = vpop.eup %1412 }
 0x1df   :  { %v1774_v29 = vpop.eup %1414 }
 0x1e0   :  { %v1777_v17 = vpop.eup %1416 }
 0x1e1   :  { %449 = vperm.xlu1 %1352, %v1760_v19   ;;  %v1780_v30 = vpop.eup %1418 }
 0x1e3   :  { %446 = vperm.xlu2 %1353, %v1762_v24   ;;  %461 = vperm.xlu0 %1351, %v1765_v25  }
 0x1e9   :  { %458 = vperm.xlu1 %1352, %v1771_v27  }
 0x1eb   :  { %455 = vperm.xlu2 %1353, %v1774_v29  }
 0x1f1   :  { %467 = vperm.xlu1 %1352, %v1777_v17  }
 0x1f3   :  { %464 = vperm.xlu2 %1353, %v1780_v30  }
 0x225   :  { %v429_v13 = vpop.permute.xlu2 %428 }
 0x226   :  { %v471_v38 = vperm.slane %v429_v13, %v1651_v44 }
 0x22d   :  { %v432_v31 = vpop.permute.xlu2 %431 }
 0x22e   :  { %v472_v49 = vperm.slane %v432_v31, %v1651_v44 }
 0x235   :  { %v438_v36 = vpop.permute.xlu2 %437 }
 0x236   :  { %v474_v39 = vperm.slane %v438_v36, %v1651_v44 }
 0x23b   :  { %v426_v32 = vpop.permute.xlu1 %425 }
 0x23c   :  { %v423_v33 = vpop.permute.xlu0 %422  ;;  %v470_v34 = vperm.slane %v426_v32, %v1651_v44 }
 0x23d   :  { %v469_v35 = vperm.slane %v423_v33, %v1651_v44  ;;  %v447_v40 = vpop.permute.xlu2 %446 }
 0x23e   :  { %v477_v42 = vperm.slane %v447_v40, %v1651_v44 }
 0x23f   :  { %v485_v20 = vsel %vm293_vm2, %v470_v34, %v469_v35 }
 0x240   :  { %v486_v43 = vsel %vm295_vm3, %v471_v38, %v485_v20 }
 0x241   :  { %v487_v50 = vsel %vm297_vm4, %v472_v49, %v486_v43 }
 0x243   :  { %v435_v37 = vpop.permute.xlu1 %434 }
 0x244   :  { %v473_v47 = vperm.slane %v435_v37, %v1651_v44  ;;  %v444_v51 = vpop.permute.xlu0 %443 }
 0x245   :  { %v476_v55 = vperm.slane %v444_v51, %v1651_v44  ;;  %v456_v3 = vpop.permute.xlu2 %455 }
 0x246   :  { %v488_v23 = vsel %vm2187_vm5, %v473_v47, %v487_v50  ;;  %v480_v9 = vperm.slane %v456_v3, %v1651_v44 }
 0x247   :  { %v489_v56 = vsel %vm2186_vm6, %v474_v39, %v488_v23 }
 0x24b   :  { %v441_v41 = vpop.permute.xlu1 %440 }
 0x24c   :  { %v475_v45 = vperm.slane %v441_v41, %v1651_v44 }
 0x24d   :  { %v453_v61 = vpop.permute.xlu0 %452  ;;  %v465_v15 = vpop.permute.xlu2 %464 }
 0x24e   :  { %v490_v57 = vsel %vm2185_vm7, %v475_v45, %v489_v56  ;;  %v479_v5 = vperm.slane %v453_v61, %v1651_v44  ;;  %v483_v22 = vperm.slane %v465_v15, %v1651_v44 }
 0x24f   :  { %v491_v58 = vsel %vm2184_vm8, %v476_v55, %v490_v57 }
 0x250   :  { %v501_v59 = vsel %vm316_vm9, %v491_v58, 0.0 }
 0x251   :  { %502 = vadd.xlane.f32.xlu0 %v501_v59 }
 0x253   :  { %v450_v63 = vpop.permute.xlu1 %449 }
 0x254   :  { %v478_v0 = vperm.slane %v450_v63, %v1651_v44 }
 0x255   :  { %v462_v12 = vpop.permute.xlu0 %461 }
 0x256   :  { %v492_v4 = vsel %vm293_vm2, %v478_v0, %v477_v42  ;;  %v482_v18 = vperm.slane %v462_v12, %v1651_v44 }
 0x257   :  { %v493_v6 = vsel %vm295_vm3, %v479_v5, %v492_v4 }
 0x258   :  { %v494_v16 = vsel %vm297_vm4, %v480_v9, %v493_v6 }
 0x25b   :  { %v459_v8 = vpop.permute.xlu1 %458 }
 0x25c   :  { %v481_v11 = vperm.slane %v459_v8, %v1651_v44 }
 0x25e   :  { %v495_v48 = vsel %vm2187_vm5, %v481_v11, %v494_v16 }
 0x25f   :  { %v496_v21 = vsel %vm2186_vm6, %v482_v18, %v495_v48 }
 0x260   :  { %v497_v26 = vsel %vm2185_vm7, %v483_v22, %v496_v21 }
 0x263   :  { %v468_v7 = vpop.permute.xlu1 %467 }
 0x264   :  { %v484_v1 = vperm.slane %v468_v7, %v1651_v44 }
 0x266   :  { %v498_v28 = vsel %vm2184_vm8, %v484_v1, %v497_v26 }
 0x267   :  { %v504_v13 = vsel %vm316_vm9, %v498_v28, 0.0 }
 0x268   :  { %505 = vadd.xlane.f32.xlu2 %v504_v13 }
 0x2c4   :  { %v503_v31 = vpop.xlane.xlu0 %502 }
 0x2c5   :  { %v509_v32 = vperm.slane %v503_v31, 0  ;;  %v1815_v33 = vperm.slane %v503_v31, 1  ;;  %v1817_v34 = vperm.slane %v503_v31, 2  ;;  %v1819_v35 = vperm.slane %v503_v31, 3 }
 0x2c6   :  { %v1822_v36 = vperm.slane %v503_v31, 6  ;;  %v1825_v20 = vperm.slane %v503_v31, 7  ;;  %v1837_v51 = vperm.slane %v503_v31, 4  ;;  %v1839_v39 = vperm.slane %v503_v31, 5 }
 0x2c7   :  { %1420 = vrcp.f32 %v509_v32  ;;  %v550_v50 = vand.u32 2147483647, %v509_v32  ;;  %vm546_vm10 = vweird.f32 %v509_v32  ;;  %v552_v56 = vand.u32 2147483648, %v509_v32 }
 0x2c8   :  { %1422 = vrcp.f32 %v1815_v33  ;;  %v657_v49 = vand.u32 2147483648, %v1825_v20  ;;  %v655_v55 = vand.u32 2147483647, %v1825_v20  ;;  %vm636_vm11 = vweird.f32 %v1822_v36 }
 0x2c9   :  { %1424 = vrcp.f32 %v1817_v34  ;;  %v640_v58 = vand.u32 2147483647, %v1822_v36  ;;  %v642_v59 = vand.u32 2147483648, %v1822_v36  ;;  %vm651_vm13 = vweird.f32 %v1825_v20 }
 0x2ca   :  { %1426 = vrcp.f32 %v1819_v35  ;;  %v658_v0 = vor.u32 1.1754944e-38, %v657_v49  ;;  %vm1850_vm14 = vcmp.eq.f32.partialorder %v550_v50, 8.507059e+37  ;;  %vm1860_vm15 = vcmp.eq.f32.partialorder %v655_v55, 8.507059e+37 }
 0x2cb   :  { %1428 = vrcp.f32 %v1822_v36  ;;  %v553_v16 = vor.u32 1.1754944e-38, %v552_v56  ;;  %vm561_vm0 = vweird.f32 %v1815_v33  ;;  %v565_v48 = vand.u32 2147483647, %v1815_v33 }
 0x2cc   :  { %1430 = vrcp.f32 %v1825_v20  ;;  %v567_v1 = vand.u32 2147483648, %v1815_v33 }
 0x2cd   :  { %v1421_v37 = vpop.eup %1420  ;;  %1432 = vrcp.f32 %v1837_v51  ;;  %vm566_vm6 = vcmp.eq.f32.partialorder %v565_v48, 8.507059e+37 }
 0x2ce   :  { %v1829_v38 = vpop.eup %1422  ;;  %v542_v43 = vmul.f32 %v1421_v37, %v509_v32  ;;  %vm547_vm12 = vweird.f32 %v1421_v37  ;;  %v568_v55 = vor.u32 1.1754944e-38, %v567_v1  ;;  %1434 = vrcp.f32 %v1839_v39 }
 0x2cf   :  { %v1832_v47 = vpop.eup %1424  ;;  %v557_v23 = vmul.f32 %v1829_v38, %v1815_v33  ;;  %vm548_vm1 = vmor %vm546_vm10, %vm547_vm12  ;;  %vm562_vm8 = vweird.f32 %v1829_v38 }
 0x2d0   :  { %v543_v41 = vsub.f32 1.0, %v542_v43  ;;  %v572_v40 = vmul.f32 %v1832_v47, %v1817_v34  ;;  %v1843_v45 = vpop.eup %1426  ;;  %v643_v43 = vor.u32 1.1754944e-38, %v642_v59  ;;  %vm1880_vm7 = vmor %vm561_vm0, %vm562_vm8  ;;  %vm577_vm8 = vweird.f32 %v1832_v47 }
 0x2d1   :  { %v558_v57 = vsub.f32 1.0, %v557_v23  ;;  %v1429_v63 = vpop.eup %1428  ;;  %v587_v9 = vmul.f32 %v1843_v45, %v1819_v35 }
 0x2d2   :  { %v544_v61 = vmul.f32 %v1421_v37, %v543_v41  ;;  %v573_v4 = vsub.f32 1.0, %v572_v40  ;;  %v1431_v5 = vpop.eup %1430  ;;  %v632_v6 = vmul.f32 %v1429_v63, %v1822_v36  ;;  %vm637_vm10 = vweird.f32 %v1429_v63 }
 0x2d3   :  { %v559_v3 = vmul.f32 %v1829_v38, %v558_v57  ;;  %v647_v11 = vmul.f32 %v1431_v5, %v1825_v20  ;;  %v588_v31 = vsub.f32 1.0, %v587_v9  ;;  %vm652_vm12 = vweird.f32 %v1431_v5  ;;  %v1884_v50 = vpop.eup %1432  ;;  %vm638_vm0 = vmor %vm636_vm11, %vm637_vm10 }
 0x2d4   :  { %v545_v8 = vadd.f32 %v1421_v37, %v544_v61  ;;  %v633_v15 = vsub.f32 1.0, %v632_v6  ;;  %v574_v26 = vmul.f32 %v1832_v47, %v573_v4  ;;  %v582_v41 = vand.u32 2147483648, %v1817_v34  ;;  %v1941_v12 = vpop.eup %1434 }
 0x2d5   :  { %v560_v21 = vadd.f32 %v1829_v38, %v559_v3  ;;  %v648_v22 = vsub.f32 1.0, %v647_v11  ;;  %v580_v57 = vand.u32 2147483647, %v1817_v34  ;;  %v602_v9 = vmul.f32 %v1884_v50, %v1837_v51 }
 0x2d6   :  { %v549_v18 = vsel %vm548_vm1, %v1421_v37, %v545_v8  ;;  %v634_v28 = vmul.f32 %v1429_v63, %v633_v15  ;;  %vm1874_vm1 = vcmp.eq.f32.partialorder %v640_v58, 8.507059e+37  ;;  %v575_v56 = vadd.f32 %v1832_v47, %v574_v26 }
 0x2d7   :  { %v554_v7 = vsel %vm1850_vm14, %v553_v16, %v549_v18  ;;  %v649_v32 = vmul.f32 %v1431_v5, %v648_v22  ;;  %vm576_vm14 = vweird.f32 %v1817_v34  ;;  %v589_v58 = vmul.f32 %v1843_v45, %v588_v31 }
 0x2d8   :  { %v555_v13 = vmul.f32 %v1727_v53, %v554_v7  ;;  %v635_v23 = vadd.f32 %v1429_v63, %v634_v28  ;;  %v564_v53 = vsel %vm1880_vm7, %v1829_v38, %v560_v21  ;;  %vm653_vm7 = vmor %vm651_vm13, %vm652_vm12  ;;  %v583_v8 = vor.u32 1.1754944e-38, %v582_v41 }
 0x2d9   :  { %v650_v40 = vadd.f32 %v1431_v5, %v649_v32  ;;  %v569_v42 = vsel %vm566_vm6, %v568_v55, %v564_v53  ;;  %vm1914_vm11 = vmor %vm576_vm14, %vm577_vm8  ;;  %v595_v34 = vand.u32 2147483647, %v1819_v35  ;;  %vm581_vm6 = vcmp.eq.f32.partialorder %v580_v57, 8.507059e+37 }
 0x2da   :  { %783 = vperm.xlu1 %1352, %v555_v13   ;;  %v639_v38 = vsel %vm638_vm0, %v1429_v63, %v635_v23  ;;  %v579_v6 = vsel %vm1914_vm11, %v1832_v47, %v575_v56  ;;  %vm592_vm13 = vweird.f32 %v1843_v45  ;;  %v603_v18 = vsub.f32 1.0, %v602_v9 }
 0x2db   :  { %v1894_v33 = vpop.xlane.xlu2 %505  ;;  %v654_v59 = vsel %vm653_vm7, %v1431_v5, %v650_v40  ;;  %v644_v36 = vsel %vm1874_vm1, %v643_v43, %v639_v38  ;;  %v584_v11 = vsel %vm581_vm6, %v583_v8, %v579_v6  ;;  %vm1951_vm12 = vcmp.eq.f32.partialorder %v595_v34, 8.507059e+37 }
 0x2dc   :  { %v1906_v61 = vperm.slane %v1894_v33, 2  ;;  %v659_v20 = vsel %vm1860_vm15, %v658_v0, %v654_v59  ;;  %v645_v63 = vmul.f32 %v1749_v10, %v644_v36  ;;  %v1920_v5 = vperm.slane %v1894_v33, 4 }
 0x2dd   :  { %v660_v4 = vmul.f32 %v1739_v2, %v659_v20  ;;  %v1926_v0 = vperm.slane %v1894_v33, 5  ;;  %v570_v10 = vmul.f32 %v1725_v52, %v569_v42  ;;  %v590_v2 = vadd.f32 %v1843_v45, %v589_v58 }
 0x2de   :  { %945 = vperm.xlu2 %1353, %v645_v63   ;;  %1436 = vrcp.f32 %v1906_v61  ;;  %v1936_v47 = vperm.slane %v1894_v33, 7  ;;  %v597_v52 = vand.u32 2147483648, %v1819_v35  ;;  %vm591_vm15 = vweird.f32 %v1819_v35 }
 0x2df   :  { %972 = vperm.xlu0 %1351, %v660_v4   ;;  %1438 = vrcp.f32 %v1920_v5  ;;  %v1944_v16 = vperm.slane %v1894_v33, 0  ;;  %vm1947_vm10 = vmor %vm591_vm15, %vm592_vm13  ;;  %v1956_v21 = vperm.slane %v1894_v33, 1  ;;  %v585_v35 = vmul.f32 %v1730_v54, %v584_v11 }
 0x2e0   :  { %1440 = vrcp.f32 %v1926_v0  ;;  %v700_v22 = vand.u32 2147483647, %v1906_v61  ;;  %v594_v7 = vsel %vm1947_vm10, %v1843_v45, %v590_v2  ;;  %vm606_vm1 = vweird.f32 %v1837_v51 }
 0x2e1   :  { %1442 = vrcp.f32 %v1936_v47  ;;  %v702_v1 = vand.u32 2147483648, %v1906_v61  ;;  %v598_v26 = vor.u32 1.1754944e-38, %v597_v52  ;;  %vm607_vm14 = vweird.f32 %v1884_v50 }
 0x2e2   :  { %810 = vperm.xlu1 %1352, %v570_v10   ;;  %v730_v13 = vand.u32 2147483647, %v1920_v5  ;;  %v732_v54 = vand.u32 2147483648, %v1920_v5  ;;  %v610_v31 = vand.u32 2147483647, %v1837_v51  ;;  %v612_v32 = vand.u32 2147483648, %v1837_v51  ;;  %vm2008_vm10 = vmor %vm606_vm1, %vm607_vm14 }
 0x2e3   :  { %1444 = vrcp.f32 %v1944_v16  ;;  %v599_v37 = vsel %vm1951_vm12, %v598_v26, %v594_v7  ;;  %v604_v43 = vmul.f32 %v1884_v50, %v603_v18  ;;  %vm696_vm0 = vweird.f32 %v1906_v61 }
 0x2e4   :  { %v1437_v28 = vpop.eup %1436  ;;  %1446 = vrcp.f32 %v1956_v21  ;;  %vm1978_vm8 = vcmp.eq.f32.partialorder %v700_v22, 8.507059e+37  ;;  %vm726_vm7 = vweird.f32 %v1920_v5  ;;  %v703_v40 = vor.u32 1.1754944e-38, %v702_v1 }
 0x2e5   :  { %v692_v45 = vmul.f32 %v1437_v28, %v1906_v61  ;;  %v1439_v49 = vpop.eup %1438  ;;  %v617_v56 = vmul.f32 %v1941_v12, %v1839_v39  ;;  %vm1988_vm11 = vcmp.eq.f32.partialorder %v730_v13, 8.507059e+37  ;;  %v733_v57 = vor.u32 1.1754944e-38, %v732_v54 }
 0x2e6   :  { %v1983_v53 = vpop.eup %1440  ;;  %v722_v55 = vmul.f32 %v1439_v49, %v1920_v5  ;;  %v600_v58 = vmul.f32 %v1742_v46, %v599_v37  ;;  %vm697_vm6 = vweird.f32 %v1437_v28  ;;  %v605_v63 = vadd.f32 %v1884_v50, %v604_v43 }
 0x2e7   :  { %v693_v41 = vsub.f32 1.0, %v692_v45  ;;  %v737_v59 = vmul.f32 %v1983_v53, %v1926_v0  ;;  %v1995_v36 = vpop.eup %1442  ;;  %vm741_vm13 = vweird.f32 %v1926_v0  ;;  %v745_v4 = vand.u32 2147483647, %v1926_v0  ;;  %vm698_vm12 = vmor %vm696_vm0, %vm697_vm6 }
 0x2e8   :  { %v723_v20 = vsub.f32 1.0, %v722_v55  ;;  %v767_v6 = vmul.f32 %v1995_v36, %v1936_v47  ;;  %vm727_vm15 = vweird.f32 %v1439_v49  ;;  %v618_v9 = vsub.f32 1.0, %v617_v56 }
 0x2e9   :  { %v694_v42 = vmul.f32 %v1437_v28, %v693_v41  ;;  %v738_v3 = vsub.f32 1.0, %v737_v59  ;;  %v2002_v8 = vpop.eup %1444  ;;  %v747_v52 = vand.u32 2147483648, %v1926_v0  ;;  %vm771_vm5 = vweird.f32 %v1936_v47  ;;  %vm728_vm14 = vmor %vm726_vm7, %vm727_vm15 }
 0x2ea   :  { %837 = vperm.xlu1 %1352, %v585_v35   ;;  %v724_v10 = vmul.f32 %v1439_v49, %v723_v20  ;;  %v2012_v2 = vpop.eup %1446  ;;  %v768_v48 = vsub.f32 1.0, %v767_v6  ;;  %vm742_vm1 = vweird.f32 %v1983_v53  ;;  %v609_v35 = vsel %vm2008_vm10, %v1884_v50, %v605_v63 }
 0x2eb   :  { %v695_v46 = vadd.f32 %v1437_v28, %v694_v42  ;;  %v739_v11 = vmul.f32 %v1983_v53, %v738_v3  ;;  %vm772_vm0 = vweird.f32 %v1995_v36  ;;  %v662_v50 = vmul.f32 %v2002_v8, %v1944_v16 }
 0x2ec   :  { %v725_v18 = vadd.f32 %v1439_v49, %v724_v10  ;;  %v769_v7 = vmul.f32 %v1995_v36, %v768_v48  ;;  %v613_v45 = vor.u32 1.1754944e-38, %v612_v32  ;;  %vm611_vm7 = vcmp.eq.f32.partialorder %v610_v31, 8.507059e+37  ;;  %vm2058_vm6 = vmor %vm771_vm5, %vm772_vm0 }
 0x2ed   :  { %v699_v15 = vsel %vm698_vm12, %v1437_v28, %v695_v46  ;;  %v740_v61 = vadd.f32 %v1983_v53, %v739_v11  ;;  %v619_v28 = vmul.f32 %v1941_v12, %v618_v9  ;;  %v2052_v0 = vperm.slane %v1894_v33, 3 }
 0x2ee   :  { %v704_v22 = vsel %vm1978_vm8, %v703_v40, %v699_v15  ;;  %v729_v26 = vsel %vm728_vm14, %v1439_v49, %v725_v18  ;;  %vm2038_vm8 = vmor %vm741_vm13, %vm742_vm1  ;;  %v770_v54 = vadd.f32 %v1995_v36, %v769_v7  ;;  %v775_v49 = vand.u32 2147483647, %v1936_v47 }
 0x2ef   :  { %v705_v1 = vmul.f32 %v1754_v60, %v704_v22  ;;  %v734_v13 = vsel %vm1988_vm11, %v733_v57, %v729_v26  ;;  %v777_v60 = vand.u32 2147483648, %v1936_v47  ;;  %v744_v43 = vsel %vm2038_vm8, %v1983_v53, %v740_v61 }
 0x2f0   :  { %v735_v37 = vmul.f32 %v1771_v27, %v734_v13  ;;  %vm746_vm11 = vcmp.eq.f32.partialorder %v745_v4, 8.507059e+37  ;;  %v748_v23 = vor.u32 1.1754944e-38, %v747_v52  ;;  %v614_v32 = vsel %vm611_vm7, %v613_v45, %v609_v35 }
 0x2f1   :  { %1053 = vperm.xlu0 %1351, %v705_v1   ;;  %v774_v51 = vsel %vm2058_vm6, %v1995_v36, %v770_v54  ;;  %v620_v31 = vadd.f32 %v1941_v12, %v619_v28  ;;  %vm622_vm13 = vweird.f32 %v1941_v12  ;;  %v663_v53 = vsub.f32 1.0, %v662_v50 }
 0x2f2   :  { %864 = vperm.xlu1 %1352, %v600_v58   ;;  %1107 = vperm.xlu2 %1353, %v735_v37   ;;  %v749_v41 = vsel %vm746_vm11, %v748_v23, %v744_v43  ;;  %v778_v40 = vor.u32 1.1754944e-38, %v777_v60  ;;  %v627_v55 = vand.u32 2147483648, %v1839_v39  ;;  %vm776_vm15 = vcmp.eq.f32.partialorder %v775_v49, 8.507059e+37  ;;  %v1452_v23 = vld [vmem:[#allocation2 + $0x30] sm:$0xff] }
 0x2f3   :  { %v615_v47 = vmul.f32 %v1736_v62, %v614_v32  ;;  %vm621_vm5 = vweird.f32 %v1839_v39  ;;  %v625_v56 = vand.u32 2147483647, %v1839_v39  ;;  %1448 = vrcp.f32 %v2052_v0  ;;  %v1453_v32 = vld [vmem:[#allocation2 + $0x38] sm:$0xff] }
 0x2f4   :  { %v779_v38 = vsel %vm776_vm15, %v778_v40, %v774_v51  ;;  %vm623_vm10 = vmor %vm621_vm5, %vm622_vm13  ;;  %v750_v57 = vmul.f32 %v1765_v25, %v749_v41  ;;  %v664_v59 = vmul.f32 %v2002_v8, %v663_v53  ;;  %v677_v36 = vmul.f32 %v2012_v2, %v1956_v21  ;;  %v1455_v40 = vld [vmem:[#allocation2 + $0x48] sm:$0xff] }
 0x2f5   :  { %v624_v58 = vsel %vm623_vm10, %v1941_v12, %v620_v31  ;;  %v628_v42 = vor.u32 1.1754944e-38, %v627_v55  ;;  %v780_v62 = vmul.f32 %v1777_v17, %v779_v38  ;;  %vm626_vm12 = vcmp.eq.f32.partialorder %v625_v56, 8.507059e+37 }
 0x2f6   :  { %v523_v39 = vperm.slane %v1894_v33, 6  ;;  %v665_v63 = vadd.f32 %v2002_v8, %v664_v59  ;;  %vm667_vm1 = vweird.f32 %v2002_v8  ;;  %v678_v25 = vsub.f32 1.0, %v677_v36  ;;  %v1457_v59 = vld [vmem:[#allocation2 + $0x60] sm:$0xff] }
 0x2f7   :  { %v629_v20 = vsel %vm626_vm12, %v628_v42, %v624_v58  ;;  %v672_v3 = vand.u32 2147483648, %v1944_v16  ;;  %vm666_vm14 = vweird.f32 %v1944_v16  ;;  %v670_v6 = vand.u32 2147483647, %v1944_v16  ;;  %v1456_v58 = vld [vmem:[#allocation2 + $0x50] sm:$0xff] }
 0x2f8   :  { %v630_v4 = vmul.f32 %v1751_v14, %v629_v20  ;;  %1450 = vrcp.f32 %v523_v39  ;;  %vm668_vm0 = vmor %vm666_vm14, %vm667_vm1  ;;  %v679_v33 = vmul.f32 %v2012_v2, %v678_v25  ;;  %vm682_vm7 = vweird.f32 %v2012_v2 }
 0x2f9   :  { %1134 = vperm.xlu0 %1351, %v750_v57   ;;  %v1449_v12 = vpop.eup %1448  ;;  %v669_v17 = vsel %vm668_vm0, %v2002_v8, %v665_v63  ;;  %v673_v10 = vor.u32 1.1754944e-38, %v672_v3  ;;  %vm671_vm8 = vcmp.eq.f32.partialorder %v670_v6, 8.507059e+37  ;;  %v687_v16 = vand.u32 2147483648, %v1956_v21  ;;  %v1458_v6 = vld [vmem:[#allocation2 + $0x68] sm:$0xff] }
 0x2fa   :  { %891 = vperm.xlu1 %1352, %v615_v47   ;;  %1188 = vperm.xlu2 %1353, %v780_v62   ;;  %v707_v46 = vmul.f32 %v1449_v12, %v2052_v0  ;;  %v680_v9 = vadd.f32 %v2012_v2, %v679_v33  ;;  %vm681_vm11 = vweird.f32 %v1956_v21  ;;  %v685_v8 = vand.u32 2147483647, %v1956_v21 }
 0x2fb   :  { %v674_v34 = vsel %vm671_vm8, %v673_v10, %v669_v17  ;;  %vm683_vm6 = vmor %vm681_vm11, %vm682_vm7  ;;  %v688_v35 = vor.u32 1.1754944e-38, %v687_v16  ;;  %vm712_vm15 = vweird.f32 %v1449_v12  ;;  %v717_v1 = vand.u32 2147483648, %v2052_v0  ;;  %v1459_v17 = vld [vmem:[#allocation2 + $0x58] sm:$0xff] }
 0x2fc   :  { %v708_v14 = vsub.f32 1.0, %v707_v46  ;;  %v675_v52 = vmul.f32 %v1762_v24, %v674_v34  ;;  %v684_v48 = vsel %vm683_vm6, %v2012_v2, %v680_v9  ;;  %vm686_vm13 = vcmp.eq.f32.partialorder %v685_v8, 8.507059e+37  ;;  %v1460_v9 = vld [vmem:[#allocation2 + $0x70] sm:$0xff] }
 0x2fd   :  { %v689_v22 = vsel %vm686_vm13, %v688_v35, %v684_v48  ;;  %vm711_vm5 = vweird.f32 %v2052_v0  ;;  %v715_v21 = vand.u32 2147483647, %v2052_v0  ;;  %v718_v28 = vor.u32 1.1754944e-38, %v717_v1  ;;  %v1461_v48 = vld [vmem:[#allocation2 + $0x78] sm:$0xff] }
 0x2fe   :  { %v1451_v11 = vpop.eup %1450  ;;  %v709_v15 = vmul.f32 %v1449_v12, %v708_v14  ;;  %v690_v24 = vmul.f32 %v1760_v19, %v689_v22  ;;  %vm713_vm10 = vmor %vm711_vm5, %vm712_vm15  ;;  %v762_v5 = vand.u32 2147483648, %v523_v39  ;;  %vm756_vm14 = vweird.f32 %v523_v39 }
 0x2ff   :  { %v752_v18 = vmul.f32 %v1451_v11, %v523_v39  ;;  %vm716_vm12 = vcmp.eq.f32.partialorder %v715_v21, 8.507059e+37  ;;  %vm757_vm1 = vweird.f32 %v1451_v11  ;;  %v760_v60 = vand.u32 2147483647, %v523_v39 }
 0x300   :  { %v710_v61 = vadd.f32 %v1449_v12, %v709_v15  ;;  %vm758_vm0 = vmor %vm756_vm14, %vm757_vm1  ;;  %v763_v45 = vor.u32 1.1754944e-38, %v762_v5  ;;  %vm2212_vm7 = vcmask 1044484   ;;  %vm2213_vm11 = vcmask 1045509  }
 0x301   :  { %v753_v7 = vsub.f32 1.0, %v752_v18  ;;  %vm761_vm8 = vcmp.eq.f32.partialorder %v760_v60, 8.507059e+37  ;;  %vm2214_vm6 = vcmask 1046534   ;;  %vm2215_vm13 = vcmask 1047559   ;;  %vm2216_vm15 = vmmov %vm2212_vm7 }
 0x302   :  { %918 = vperm.xlu1 %1352, %v630_v4   ;;  %v714_v26 = vsel %vm713_vm10, %v1449_v12, %v710_v61  ;;  %vm2217_vm5 = vmmov %vm2213_vm11 }
 0x303   :  { %v754_v2 = vmul.f32 %v1451_v11, %v753_v7  ;;  %v719_v50 = vsel %vm716_vm12, %v718_v28, %v714_v26  ;;  %vm2218_vm10 = vmmov %vm2214_vm6 }
 0x304   :  { %v720_v54 = vmul.f32 %v1774_v29, %v719_v50  ;;  %vm2219_vm12 = vmmov %vm2215_vm13 }
 0x305   :  { %v755_v13 = vadd.f32 %v1451_v11, %v754_v2  ;;  %vm2221_vm1 = vmmov %vm2217_vm5 }
 0x306   :  { %vm2222_vm14 = vmmov %vm2214_vm6 }
 0x307   :  { %v759_v19 = vsel %vm758_vm0, %v1451_v11, %v755_v13  ;;  %vm2223_vm0 = vmmov %vm2219_vm12 }
 0x308   :  { %v764_v37 = vsel %vm761_vm8, %v763_v45, %v759_v19  ;;  %vm2224_vm8 = vcmask 261120  }
 0x309   :  { %v765_v43 = vmul.f32 %v1780_v30, %v764_v37  ;;  %v1454_v30 = vld [vmem:[#allocation2 + $0x40] sm:$0xff] }
 0x30a   :  { %999 = vperm.xlu1 %1352, %v675_v52  }
 0x312   :  { %1026 = vperm.xlu1 %1352, %v690_v24  }
 0x31a   :  { %1080 = vperm.xlu1 %1352, %v720_v54  }
 0x322   :  { %1161 = vperm.xlu1 %1352, %v765_v43  }
 0x338   :  { %v946_v55 = vpop.permute.xlu2 %945 }
 0x339   :  { %v947_v56 = vperm.slane %v946_v55, %v1651_v44 }
 0x34c   :  { %v784_v49 = vpop.permute.xlu1 %783  ;;  %v1108_v8 = vpop.permute.xlu2 %1107 }
 0x34d   :  { %v785_v0 = vperm.slane %v784_v49, %v1651_v44  ;;  %v1109_v35 = vperm.slane %v1108_v8, %v1651_v44 }
 0x34f   :  { %1318 = vmatmul.msk.f32.vlgmr.msrb.gmra.mxu1 %vm316_vm9, %v785_v0 }
 0x350   :  { %965 = vmatpush.msrb.mxu1 %v1452_v23 }
 0x351   :  { %v973_v57 = vpop.permute.xlu0 %972 }
 0x352   :  { %v974_v39 = vperm.slane %v973_v57, %v1651_v44 }
 0x354   :  { %v811_v27 = vpop.permute.xlu1 %810  ;;  %v1189_v1 = vpop.permute.xlu2 %1188 }
 0x355   :  { %v812_v29 = vperm.slane %v811_v27, %v1651_v44  ;;  %v1190_v26 = vperm.slane %v1189_v1, %v1651_v44 }
 0x357   :  { %1319 = vmatmul.msk.f32.vlgmr.msrb.gmra.mxu2 %vm316_vm9, %v812_v29  ;;  %v1261_v36 = vsel %vm293_vm2, %v812_v29, %v785_v0 }
 0x358   :  { %992 = vmatpush.msrb.mxu2 %v1453_v32 }
 0x35c   :  { %v838_v51 = vpop.permute.xlu1 %837 }
 0x35d   :  { %v839_v31 = vperm.slane %v838_v51, %v1651_v44 }
 0x35f   :  { %1320 = vmatmul.msk.f32.vlgmr.msrb.gmra.mxu3 %vm316_vm9, %v839_v31  ;;  %v1262_v42 = vsel %vm295_vm3, %v839_v31, %v1261_v36 }
 0x360   :  { %1019 = vmatpush.msrb.mxu3 %v1454_v30 }
 0x363   :  { %v1054_v3 = vpop.permute.xlu0 %1053 }
 0x364   :  { %v865_v53 = vpop.permute.xlu1 %864  ;;  %v1055_v10 = vperm.slane %v1054_v3, %v1651_v44 }
 0x365   :  { %v866_v41 = vperm.slane %v865_v53, %v1651_v44 }
 0x367   :  { %1321 = vmatmul.msk.f32.vlgmr.msra.gmra.mxu1 %vm316_vm9, %v866_v41  ;;  %v1263_v20 = vsel %vm297_vm4, %v866_v41, %v1262_v42 }
 0x368   :  { %1046 = vmatpush.msra.mxu1 %v1455_v40 }
 0x36b   :  { %v1135_v14 = vpop.permute.xlu0 %1134 }
 0x36c   :  { %v892_v47 = vpop.permute.xlu1 %891  ;;  %v1136_v16 = vperm.slane %v1135_v14, %v1651_v44 }
 0x36d   :  { %v893_v38 = vperm.slane %v892_v47, %v1651_v44 }
 0x36f   :  { %1322 = vmatmul.msk.f32.vlgmr.msra.gmra.mxu2 %vm316_vm9, %v893_v38  ;;  %1324 = vmatmul.msk.f32.vlgmr.msrb.gmra.mxu1 %vm316_vm9, %v947_v56  ;;  %v1264_v25 = vsel %vm2212_vm7, %v893_v38, %v1263_v20 }
 0x370   :  { %1073 = vmatpush.msra.mxu2 %v1456_v58  ;;  %1127 = vmatpush.msrb.mxu1 %v1457_v59 }
 0x374   :  { %v919_v62 = vpop.permute.xlu1 %918 }
 0x375   :  { %v920_v63 = vperm.slane %v919_v62, %v1651_v44 }
 0x377   :  { %v1265_v12 = vsel %vm2213_vm11, %v920_v63, %v1264_v25  ;;  %1323 = vmatmul.msk.f32.vlgmr.msra.gmra.mxu3 %vm316_vm9, %v920_v63  ;;  %1325 = vmatmul.msk.f32.vlgmr.msrb.gmra.mxu2 %vm316_vm9, %v974_v39  ;;  %vm2228_vm11 = vmmov %vm2224_vm8 }
 0x378   :  { %v1266_v4 = vsel %vm2214_vm6, %v947_v56, %v1265_v12  ;;  %1154 = vmatpush.msrb.mxu2 %v1458_v6  ;;  %1100 = vmatpush.msra.mxu3 %v1459_v17 }
 0x379   :  { %v1267_v33 = vsel %vm2215_vm13, %v974_v39, %v1266_v4 }
 0x37a   :  { %1277 = vst.msk [vmem:[%s2182_s5] sm:$0xff] %vm316_vm9, %v1267_v33 }
 0x37c   :  { %v1000_v46 = vpop.permute.xlu1 %999 }
 0x37d   :  { %v1001_v34 = vperm.slane %v1000_v46, %v1651_v44 }
 0x37f   :  { %1326 = vmatmul.msk.f32.vlgmr.msrb.gmra.mxu3 %vm316_vm9, %v1001_v34  ;;  %1328 = vmatmul.msk.f32.vlgmr.msra.gmra.mxu2 %vm316_vm9, %v1055_v10 }
 0x380   :  { %1181 = vmatpush.msrb.mxu3 %v1460_v9 }
 0x384   :  { %v1027_v11 = vpop.permute.xlu1 %1026 }
 0x385   :  { %v1028_v52 = vperm.slane %v1027_v11, %v1651_v44 }
 0x387   :  { %1327 = vmatmul.msk.f32.vlgmr.msra.gmra.mxu1 %vm316_vm9, %v1028_v52  ;;  %1331 = vmatmul.msk.f32.vlgmr.msrb.gmra.mxu2 %vm316_vm9, %v1136_v16  ;;  %v1268_v15 = vsel %vm293_vm2, %v1028_v52, %v1001_v34 }
 0x388   :  { %1208 = vmatpush.msra.mxu1 %v1461_v48  ;;  %v1269_v61 = vsel %vm295_vm3, %v1055_v10, %v1268_v15 }
 0x38c   :  { %v1081_v18 = vpop.permute.xlu1 %1080 }
 0x38d   :  { %v1082_v22 = vperm.slane %v1081_v18, %v1651_v44 }
 0x38f   :  { %1329 = vmatmul.msk.f32.vlgmr.msra.gmra.mxu3 %vm316_vm9, %v1082_v22  ;;  %1330 = vmatmul.msk.f32.vlgmr.msrb.gmra.mxu1 %vm316_vm9, %v1109_v35  ;;  %v1270_v7 = vsel %vm297_vm4, %v1082_v22, %v1269_v61 }
 0x390   :  { %v1271_v24 = vsel %vm2216_vm15, %v1109_v35, %v1270_v7 }
 0x391   :  { %v1272_v28 = vsel %vm2217_vm5, %v1136_v16, %v1271_v24 }
 0x394   :  { %v1162_v21 = vpop.permute.xlu1 %1161 }
 0x395   :  { %v1163_v2 = vperm.slane %v1162_v21, %v1651_v44 }
 0x397   :  { %v1273_v50 = vsel %vm2218_vm10, %v1163_v2, %v1272_v28  ;;  %1332 = vmatmul.msk.f32.vlgmr.msrb.gmra.mxu3 %vm316_vm9, %v1163_v2  ;;  %1333 = vmatmul.msk.f32.vlgmr.msra.gmra.mxu1 %vm316_vm9, %v1190_v26 }
 0x398   :  { %v1274_v13 = vsel %vm2219_vm12, %v1190_v26, %v1273_v50 }
 0x399   :  { %1278 = vst.msk [vmem:[%s2182_s5 + $0x8] sm:$0xff] %vm316_vm9, %v1274_v13  ;;  %vm2220_vm9 = vmmov %vm2212_vm7  ;;  %s1518_s5 = smov [#allocation5]  }
 0x39a   :  { %s1283_s12 = sshll.u32 %s1518_s5, 4  ;;  %s1284_s12 = int_to_ptr.vmem [resolvable:$true] %s1283_s12 }
 0x3cc   :  { %v805_v5 = vpop.f32.mrf.mxu1 }
 0x3da   :  { %v832_v54 = vpop.f32.mrf.mxu2 }
 0x3db   :  { %v1229_v45 = vrot.slane %v832_v54, 7 }
 0x3dd   :  { %v1230_v43 = vsel %vm293_vm2, %v1229_v45, %v805_v5 }
 0x3e2   :  { %v859_v19 = vpop.f32.mrf.mxu3 }
 0x3e3   :  { %v1231_v37 = vrot.slane %v859_v19, 6 }
 0x3e4   :  { %v886_v60 = vpop.f32.mrf.mxu1 }
 0x3e5   :  { %v1233_v49 = vrot.slane %v886_v60, 5  ;;  %v1232_v0 = vsel %vm295_vm3, %v1231_v37, %v1230_v43 }
 0x3e7   :  { %v1234_v51 = vsel %vm297_vm4, %v1233_v49, %v1232_v0 }
 0x3ec   :  { %v967_v27 = vpop.f32.mrf.mxu1 }
 0x3ed   :  { %v1239_v30 = vrot.slane %v967_v27, 2 }
 0x3f2   :  { %v913_v44 = vpop.f32.mrf.mxu2 }
 0x3f3   :  { %v1235_v23 = vrot.slane %v913_v44, 4 }
 0x3f5   :  { %v1236_v53 = vsel %vm2220_vm9, %v1235_v23, %v1234_v51 }
 0x3fa   :  { %v940_v29 = vpop.f32.mrf.mxu3  ;;  %v994_v32 = vpop.f32.mrf.mxu2 }
 0x3fb   :  { %v1237_v31 = vrot.slane %v940_v29, 3  ;;  %v1241_v40 = vrot.slane %v994_v32, 1 }
 0x3fd   :  { %v1238_v41 = vsel %vm2221_vm1, %v1237_v31, %v1236_v53 }
 0x3fe   :  { %v1240_v55 = vsel %vm2222_vm14, %v1239_v30, %v1238_v41 }
 0x3ff   :  { %v1242_v47 = vsel %vm2223_vm0, %v1241_v40, %v1240_v55 }
 0x400   :  { %1259 = vst.msk [vmem:[#allocation5] sm:$0xff] %vm2224_vm8, %v1242_v47 }
 0x402   :  { %v1021_v38 = vpop.f32.mrf.mxu3  ;;  %v1075_v57 = vpop.f32.mrf.mxu2 }
 0x403   :  { %v1245_v62 = vrot.slane %v1075_v57, 6 }
 0x404   :  { %v1048_v56 = vpop.f32.mrf.mxu1 }
 0x405   :  { %v1243_v58 = vrot.slane %v1048_v56, 7 }
 0x407   :  { %v1244_v36 = vsel %vm293_vm2, %v1243_v58, %v1021_v38  ;;  %vm2225_vm2 = vmmov %vm2221_vm1 }
 0x408   :  { %v1246_v20 = vsel %vm295_vm3, %v1245_v62, %v1244_v36  ;;  %vm2226_vm3 = vmmov %vm2214_vm6 }
 0x40a   :  { %v1156_v25 = vpop.f32.mrf.mxu2 }
 0x40b   :  { %v1251_v6 = vrot.slane %v1156_v25, 3 }
 0x40c   :  { %v1129_v59 = vpop.f32.mrf.mxu1 }
 0x40d   :  { %v1249_v12 = vrot.slane %v1129_v59, 4 }
 0x412   :  { %v1102_v42 = vpop.f32.mrf.mxu3 }
 0x413   :  { %v1247_v39 = vrot.slane %v1102_v42, 5 }
 0x414   :  { %v1210_v4 = vpop.f32.mrf.mxu1 }
 0x415   :  { %v1248_v63 = vsel %vm297_vm4, %v1247_v39, %v1246_v20  ;;  %v1255_v46 = vrot.slane %v1210_v4, 1  ;;  %vm2227_vm4 = vmmov %vm2223_vm0 }
 0x416   :  { %v1250_v3 = vsel %vm2212_vm7, %v1249_v12, %v1248_v63 }
 0x417   :  { %v1252_v10 = vsel %vm2225_vm2, %v1251_v6, %v1250_v3 }
 0x41a   :  { %v1183_v17 = vpop.f32.mrf.mxu3 }
 0x41b   :  { %v1253_v33 = vrot.slane %v1183_v17, 2 }
 0x41d   :  { %v1254_v34 = vsel %vm2226_vm3, %v1253_v33, %v1252_v10 }
 0x41e   :  { %v1256_v9 = vsel %vm2227_vm4, %v1255_v46, %v1254_v34 }
 0x41f   :  { %1260 = vst.msk [vmem:[#allocation5 + $0x8] sm:$0xff] %vm2228_vm11, %v1256_v9 }
 0x420   :  { %1291 = dma.vmem_to_hbm [thread:$0]  %s1284_s12, 256, %s1286_s15, [#allocation4], %s1515_s23, %s1515_s23, %s1516_s24  }
 0x421   :  { %1512 = dma.done.wait [#allocation4], 256  }
 0x422   :  { %1513 = vsyncadd [#allocation4], 4294967040 }
 0x423   :  { %1300 = vsyncpa [#allocation3], 1 }
 0x424   :  { %1301 = vsyncpa [#allocation4], 1 }

</bundles_post_ra>
